<compile_context>
chip_gen: v6e
topology: v6e:2x2x1
jax: 0.10.0
libtpu: 0.0.40
codegen_flags: <defaults>
</compile_context>

<pallas_src>
import numpy as np
import jax
import jax.numpy as jnp
from jax.experimental import pallas as pl
from jax.experimental.pallas import tpu as pltpu


def _round_up(x, m):
    return ((x + m - 1) // m) * m


# ----------------------------- Pallas kernel -------------------------------
def _psp_bottleneck_kernel(x_ref, w_ref, basis_ref, t_ref, o_ref):
    # x_ref:     (Cp, tm)       f32  pixel tile of the raw feature map (NCHW-native)
    # w_ref:     (NOUTp, Cp)    bf16 bottleneck weight slice for the raw feats (grid-invariant)
    # basis_ref: (Kb, tm)       bf16 per-pixel bilinear basis (+ constant bias row)
    # t_ref:     (NOUTp, Kb)    bf16 folded pyramid weights for this batch image
    # o_ref:     (NOUTp, tm)    bf16 output tile (lane-dense pixels)
    x = x_ref[...].astype(jnp.bfloat16)                                  # VPU cast; mem-bound => free
    acc = jnp.dot(w_ref[...], x, preferred_element_type=jnp.float32)    # main 1x1-conv term (MXU)
    acc = acc + jnp.dot(t_ref[...], basis_ref[...],
                        preferred_element_type=jnp.float32)             # pyramid residual + bias (MXU)
    o_ref[...] = jnp.maximum(acc, 0.0).astype(o_ref.dtype)              # fused ReLU, bf16 store


def _bottleneck_pallas(x, w_feat, basis, tiny_w, *, tm_target=512, out_dtype=jnp.bfloat16):
    """For every image n: ReLU(w_feat @ x[n] + tiny_w[n] @ basis), pixel-tiled.

    x:      (N, Cp, M)     f32   raw features, NCHW-native (M = H*W pixels on lanes)
    w_feat: (NOUTp, Cp)    bf16
    basis:  (Kb, M)        bf16
    tiny_w: (N, NOUTp, Kb) bf16
    returns (N, NOUTp, M)  out_dtype
    """
    N, Cp, M = x.shape
    NOUTp = w_feat.shape[0]
    Kb = basis.shape[0]

    # Pixel tile: multiple of 128 (unmasked lane-dense stores); big enough to
    # amortize per-step overhead, small enough for >= ~8 total grid steps.
    tm_target = max(128, _round_up(tm_target, 128))       # v6e can pass 1024
    steps = max(2, pl.cdiv(8, N))                          # desired pixel tiles per image
    tm = max(128, min(tm_target, _round_up(pl.cdiv(M, steps), 128)))
    ntiles = pl.cdiv(M, tm)                                # cdiv grid: no explicit pixel pad

    out_bytes = jnp.dtype(out_dtype).itemsize
    vmem_bytes = (2 * Cp * tm * 4              # x tile, f32, double-buffered
                  + 2 * NOUTp * Cp * 2         # weight, bf16 (grid-invariant; 2 bufs allocated)
                  + 2 * Kb * tm * 2            # basis tile, bf16
                  + 2 * NOUTp * Kb * 2         # folded pyramid weights, bf16
                  + 2 * NOUTp * tm * out_bytes)
    # Cap at 48 MiB — headroom for compiler scratch on v7x's 64 MiB physical VMEM.
    vmem_limit = int(min(48 * 1024 * 1024, max(32 * 1024 * 1024, 2 * vmem_bytes)))

    return pl.pallas_call(
        _psp_bottleneck_kernel,
        out_shape=jax.ShapeDtypeStruct((N, NOUTp, M), out_dtype),
        grid_spec=pltpu.PrefetchScalarGridSpec(
            num_scalar_prefetch=0,
            grid=(N, ntiles),
            in_specs=[
                pl.BlockSpec((None, Cp, tm),    lambda n, j: (n, 0, j)),  # raw feats tile
                pl.BlockSpec((NOUTp, Cp),       lambda n, j: (0, 0)),     # weight (grid-invariant)
                pl.BlockSpec((Kb, tm),          lambda n, j: (0, j)),     # bilinear basis tile
                pl.BlockSpec((None, NOUTp, Kb), lambda n, j: (n, 0, 0)),  # per-image pyramid weights
            ],
            out_specs=pl.BlockSpec((None, NOUTp, tm), lambda n, j: (n, 0, j)),
        ),
        compiler_params=pltpu.CompilerParams(
            dimension_semantics=("parallel", "parallel"),
            vmem_limit_bytes=vmem_limit),
    )(x, w_feat, basis, tiny_w)


# ------------------------------ JAX glue ------------------------------------
def _adaptive_pool_matrix(in_size, out_size):
    """Row-stochastic matrix reproducing nn.AdaptiveAvgPool2d window rules."""
    P = np.zeros((out_size, in_size), dtype=np.float32)
    for i in range(out_size):
        start = (i * in_size) // out_size
        end = -((-(i + 1) * in_size) // out_size)  # ceil((i+1)*in/out)
        P[i, start:end] = 1.0 / (end - start)
    return jnp.asarray(P)


def _bilinear_matrix(out_size, in_size):
    """Interpolation matrix reproducing F.interpolate(mode='bilinear', align_corners=False)."""
    L = np.zeros((out_size, in_size), dtype=np.float32)
    scale = in_size / out_size
    for d in range(out_size):
        src = (d + 0.5) * scale - 0.5
        if src < 0.0:
            src = 0.0
        i0 = min(int(np.floor(src)), in_size - 1)
        i1 = min(i0 + 1, in_size - 1)
        lam1 = src - i0
        L[d, i0] += 1.0 - lam1
        L[d, i1] += lam1
    return jnp.asarray(L)


def psp_module(feats, stage_weights, bottleneck_w, bottleneck_b, sizes=(1, 2, 3, 6),
               *, tm_target=512, out_dtype=jnp.bfloat16):
    """feats: (N, C, H, W) float32 (NCHW, matching PyTorch).  Returns (N, NOUT, H, W)."""
    N, C, H, W = feats.shape
    M = H * W
    NOUT = bottleneck_w.shape[0]
    Wb = bottleneck_w.reshape(NOUT, (len(sizes) + 1) * C).astype(jnp.float32)

    Cp = _round_up(C, 16)        # bf16 sublane packing; real PSPNet C=2048 -> no pad
    NOUTp = _round_up(NOUT, 16)
    S2 = sum(s * s for s in sizes)
    Kb = _round_up(S2 + 1, 16)   # +1 constant row that carries the bottleneck bias

    # --- single-pass adaptive pooling for all stages (ONE HBM read of feats) ---
    Ph_cat = jnp.concatenate([_adaptive_pool_matrix(H, s) for s in sizes], axis=0)  # (Σs, H)
    Pw_cat = jnp.concatenate([_adaptive_pool_matrix(W, s) for s in sizes], axis=0)  # (Σs, W)
    pooled_cat = jnp.einsum('sh,nchw,tw->ncst', Ph_cat, feats, Pw_cat)              # (N, C, Σs, Σs)

    # --- fold stage conv + bottleneck slice on tiny (s x s) tensors; build
    #     basis B (Kb, M) and per-image folded weights T (N, NOUTp, Kb) ---
    basis_rows, tiny_cols, off = [], [], 0
    for idx, (s, Ws) in enumerate(zip(sizes, stage_weights)):
        pooled_s = pooled_cat[:, :, off:off + s, off:off + s]      # == AdaptiveAvgPool2d((s, s))
        off += s
        Wfold = Wb[:, idx * C:(idx + 1) * C] @ Ws                  # bottleneck-slice . stage 1x1 conv
        tiny = jnp.einsum('oc,ncij->noij', Wfold, pooled_s)        # (N, NOUT, s, s)
        tiny_cols.append(tiny.reshape(N, NOUT, s * s))
        Lh = _bilinear_matrix(H, s)                                # (H, s)
        Lw = _bilinear_matrix(W, s)                                # (W, s)
        basis_rows.append(jnp.einsum('hi,wj->ijhw', Lh, Lw).reshape(s * s, M))
    basis_rows.append(jnp.ones((1, M), jnp.float32))               # constant row -> bias
    tiny_cols.append(jnp.broadcast_to(
        bottleneck_b.astype(jnp.float32)[None, :, None], (N, NOUT, 1)))

    basis = jnp.concatenate(basis_rows, axis=0).astype(jnp.bfloat16)       # (S2+1, M)
    basis = jnp.pad(basis, ((0, Kb - (S2 + 1)), (0, 0)))
    tiny_w = jnp.concatenate(tiny_cols, axis=-1).astype(jnp.bfloat16)      # (N, NOUT, S2+1)
    tiny_w = jnp.pad(tiny_w, ((0, 0), (0, NOUTp - NOUT), (0, Kb - (S2 + 1))))

    # --- hot-path inputs: NCHW-native, no transpose, no full-res residual ---
    x = feats.reshape(N, C, M)                                     # free view (contiguous H*W)
    if Cp != C:
        x = jnp.pad(x, ((0, 0), (0, Cp - C), (0, 0)))              # only fires for tiny C (demo)
    w_feat = Wb[:, len(sizes) * C:].astype(jnp.bfloat16)           # (NOUT, C) slice for raw feats
    w_feat = jnp.pad(w_feat, ((0, NOUTp - NOUT), (0, Cp - C)))

    out = _bottleneck_pallas(x, w_feat, basis, tiny_w,
                             tm_target=tm_target, out_dtype=out_dtype)     # (N, NOUTp, M)
    return out[:, :NOUT, :].reshape(N, NOUT, H, W)


# ------------------------------- demo ---------------------------------------
if __name__ == "__main__":
    # small shapes consistent with the module
    N, C, H, W = 2, 4, 16, 16
    OUT_FEATURES = 32
    SIZES = (1, 2, 3, 6)

    key = jax.random.PRNGKey(0)
    k_x, k_b_w, k_b_b, *k_stage = jax.random.split(key, 3 + len(SIZES))

    feats = jax.random.normal(k_x, (N, C, H, W), dtype=jnp.float32)

    # deterministic parameter init (shapes follow PSPModule.__init__)
    stage_weights = [0.1 * jax.random.normal(k, (C, C), dtype=jnp.float32)
                     for k in k_stage]                                   # 1x1 conv, no bias
    bottleneck_w = 0.05 * jax.random.normal(
        k_b_w, (OUT_FEATURES, C * (len(SIZES) + 1), 1, 1), dtype=jnp.float32)
    bottleneck_b = 0.01 * jax.random.normal(k_b_b, (OUT_FEATURES,), dtype=jnp.float32)

    out = psp_module(feats, stage_weights, bottleneck_w, bottleneck_b, SIZES)
    out = jax.block_until_ready(out)

    # pure-jnp reference following the exact PyTorch op order
    # (pool -> stage conv -> upsample -> concat -> bottleneck -> ReLU), f32.
    priors = []
    for s, Ws in zip(SIZES, stage_weights):
        Ph, Pw = _adaptive_pool_matrix(H, s), _adaptive_pool_matrix(W, s)
        pooled = jnp.einsum('sh,nchw,tw->ncst', Ph, feats, Pw)
        conved = jnp.einsum('oc,ncst->nost', Ws, pooled)
        Lh, Lw = _bilinear_matrix(H, s), _bilinear_matrix(W, s)
        priors.append(jnp.einsum('hs,nost,wt->nohw', Lh, conved, Lw))
    priors.append(feats)
    cat = jnp.concatenate(priors, axis=1)
    ref = jnp.maximum(
        jnp.einsum('ok,nkhw->nohw', bottleneck_w.reshape(OUT_FEATURES, -1), cat)
        + bottleneck_b[None, :, None, None], 0.0)

    assert out.shape == (N, OUT_FEATURES, H, W)
    # tolerance accounts for bf16 MXU inputs / bf16 output (f32 accumulation inside)
    assert bool(jnp.allclose(out.astype(jnp.float32), ref, atol=2e-2, rtol=2e-2))

    print("KERNEL_OK")
</pallas_src>

<mosaic_0001>
module attributes {stable_mosaic.version = 11 : i64} {
  func.func @_psp_bottleneck_kernel(%arg0: i32, %arg1: i32, %arg2: memref<1x16x128xf32, #tpu.memory_space<vmem>>, %arg3: memref<32x16xbf16, #tpu.memory_space<vmem>>, %arg4: memref<64x128xbf16, #tpu.memory_space<vmem>>, %arg5: memref<1x32x64xbf16, #tpu.memory_space<vmem>>, %arg6: memref<1x32x128xbf16, #tpu.memory_space<vmem>>) attributes {dimension_semantics = [#tpu.dimension_semantics<parallel>, #tpu.dimension_semantics<parallel>], iteration_bounds = array<i64: 2, 2>, scalar_prefetch = 0 : i64, scratch_operands = 0 : i64, tpu.core_type = #tpu.core_type<tc>, window_params = [{transform_indices = @transform_0, window_bounds = array<i64: 1, 16, 128>}, {pipeline_mode = #tpu.pipeline_mode<synchronous>, transform_indices = @transform_1, window_bounds = array<i64: 32, 16>}, {transform_indices = @transform_2, window_bounds = array<i64: 64, 128>}, {transform_indices = @transform_3, window_bounds = array<i64: 1, 32, 64>}, {transform_indices = @transform_4, window_bounds = array<i64: 1, 32, 128>}]} {
    %c0 = arith.constant 0 : index
    %c0_0 = arith.constant 0 : index
    %c0_1 = arith.constant 0 : index
    %0 = vector.load %arg2[%c0, %c0_0, %c0_1] : memref<1x16x128xf32, #tpu.memory_space<vmem>>, vector<1x16x128xf32>
    %1 = vector.shape_cast %0 : vector<1x16x128xf32> to vector<16x128xf32>
    %2 = arith.truncf %1 : vector<16x128xf32> to vector<16x128xbf16>
    %c0_2 = arith.constant 0 : index
    %c0_3 = arith.constant 0 : index
    %3 = vector.load %arg3[%c0_2, %c0_3] : memref<32x16xbf16, #tpu.memory_space<vmem>>, vector<32x16xbf16>
    %cst = arith.constant dense<0.000000e+00> : vector<32x128xf32>
    %4 = tpu.matmul %3, %2, %cst {dimension_numbers = #tpu.dot_dimension_numbers<[1], [0], [0], [1], [0, 0, 1, 1], [], []>} : vector<32x16xbf16>, vector<16x128xbf16>, vector<32x128xf32> -> vector<32x128xf32>
    %c0_4 = arith.constant 0 : index
    %c0_5 = arith.constant 0 : index
    %c0_6 = arith.constant 0 : index
    %5 = vector.load %arg5[%c0_4, %c0_5, %c0_6] : memref<1x32x64xbf16, #tpu.memory_space<vmem>>, vector<1x32x64xbf16>
    %6 = vector.shape_cast %5 : vector<1x32x64xbf16> to vector<32x64xbf16>
    %c0_7 = arith.constant 0 : index
    %c0_8 = arith.constant 0 : index
    %7 = vector.load %arg4[%c0_7, %c0_8] : memref<64x128xbf16, #tpu.memory_space<vmem>>, vector<64x128xbf16>
    %cst_9 = arith.constant dense<0.000000e+00> : vector<32x128xf32>
    %8 = tpu.matmul %6, %7, %cst_9 {dimension_numbers = #tpu.dot_dimension_numbers<[1], [0], [0], [1], [0, 0, 1, 1], [], []>} : vector<32x64xbf16>, vector<64x128xbf16>, vector<32x128xf32> -> vector<32x128xf32>
    %9 = arith.addf %4, %8 : vector<32x128xf32>
    %cst_10 = arith.constant 0.000000e+00 : f32
    %10 = vector.broadcast %cst_10 : f32 to vector<32x128xf32>
    %11 = arith.maximumf %9, %10 : vector<32x128xf32>
    %12 = arith.truncf %11 : vector<32x128xf32> to vector<32x128xbf16>
    %c0_11 = arith.constant 0 : index
    %c0_12 = arith.constant 0 : index
    %c0_13 = arith.constant 0 : index
    %13 = vector.load %arg6[%c0_11, %c0_12, %c0_13] : memref<1x32x128xbf16, #tpu.memory_space<vmem>>, vector<1x32x128xbf16>
    %14 = vector.shape_cast %13 : vector<1x32x128xbf16> to vector<32x128xbf16>
    %15 = vector.shape_cast %12 : vector<32x128xbf16> to vector<1x32x128xbf16>
    tpu.vector_store %arg6[%c0_11, %c0_12, %c0_13], %15 {strides = array<i32>} : memref<1x32x128xbf16, #tpu.memory_space<vmem>>, vector<1x32x128xbf16>,
    return
  }
  func.func @transform_0(%arg0: i32, %arg1: i32) -> (i32, i32, i32) {
    %c0_i32 = arith.constant 0 : i32
    %c0_i32_0 = arith.constant 0 : i32
    return %arg0, %c0_i32, %arg1 : i32, i32, i32
  }
  func.func @transform_1(%arg0: i32, %arg1: i32) -> (i32, i32) {
    %c0_i32 = arith.constant 0 : i32
    %c0_i32_0 = arith.constant 0 : i32
    %c0_i32_1 = arith.constant 0 : i32
    return %c0_i32, %c0_i32_0 : i32, i32
  }
  func.func @transform_2(%arg0: i32, %arg1: i32) -> (i32, i32) {
    %c0_i32 = arith.constant 0 : i32
    %c0_i32_0 = arith.constant 0 : i32
    return %c0_i32, %arg1 : i32, i32
  }
  func.func @transform_3(%arg0: i32, %arg1: i32) -> (i32, i32, i32) {
    %c0_i32 = arith.constant 0 : i32
    %c0_i32_0 = arith.constant 0 : i32
    %c0_i32_1 = arith.constant 0 : i32
    return %arg0, %c0_i32, %c0_i32_0 : i32, i32, i32
  }
  func.func @transform_4(%arg0: i32, %arg1: i32) -> (i32, i32, i32) {
    %c0_i32 = arith.constant 0 : i32
    %c0_i32_0 = arith.constant 0 : i32
    return %arg0, %c0_i32, %arg1 : i32, i32, i32
  }
}

</mosaic_0001>

<bundles_post_ra>
// kernel: tpu_custom_call.1
= control target key start
LH: loop header
LB: loop body
LE: loop exit
PB: predicated region body
PF: predicated region fallthrough
CT: control target
= control target key end

     0   :  { %s1507_s0 = inlined_call_operand.hbm [shape: f32[2,16,256], index: 0, kind: input, shape index: {}]   ;;  %s1508_s1 = inlined_call_operand.vmem [shape: bf16[32,16], index: 1, kind: input, shape index: {}]   ;;  %s1509_s2 = inlined_call_operand.hbm [shape: bf16[64,256], index: 2, kind: input, shape index: {}]   ;;  %s1510_s3 = inlined_call_operand.hbm [shape: bf16[2,32,64], index: 3, kind: input, shape index: {}]   ;;  %s1511_s4 = inlined_call_operand.hbm [shape: bf16[2,32,256], index: 4, kind: output, shape index: {}]  }
   0x1   :  { %1529 = sst [smem:[#allocation23_spill]] %s1508_s1 }
   0x2   :  { %1530 = sst [smem:[#allocation24_spill]] %s1509_s2 }
   0x3   :  { %1531 = sst [smem:[#allocation25_spill]] %s1511_s4 }
   0x4   :  { %9 = vsyncpa [#allocation3], 0 }
   0x5   :  { %11 = vsyncpa [#allocation3 + $0x1], 0 }
   0x6   :  { %12 = vsyncpa [#allocation6], 0 }
   0x7   :  { %14 = vsyncpa [#allocation6 + $0x1], 0 }
   0x8   :  { %15 = vsyncpa [#allocation4], 0 }
   0x9   :  { %17 = vsyncpa [#allocation4 + $0x1], 0  ;;  %s1163_s15 = smov 0   ;;  %s1165_s16 = smov 0  }
   0xa   :  { %s1167_s17 = smov 0   ;;  %s1169_s18 = smov 0  }
   0xb   :  { %s1171_s19 = smov 0   ;;  %s1173_s20 = smov 0  }
   0xc   :  { %s1175_s21 = smov 0   ;;  %s1177_s22 = smov 0  }
   0xd   :  { %s1179_s23 = smov 0   ;;  %s1181_s24 = smov 0  }
   0xe   :  { %s1183_s25 = smov 0   ;;  %s1185_s26 = smov 0  }
   0xf   :  { %s1187_s27 = smov 0   ;;  %s1189_s28 = smov 0  }
  0x10 LB: > { %1532 = sst [smem:[#allocation13_spill]] %s1088_s19  ;;  %s1232_s29 = sadd.s32 4294967295, %s1124_s28   ;;  %s1124_s28 = sphi %s1189_s28, %s23_s28   ;;  %s1120_s27 = sphi %s1187_s27, %s1584_s27   ;;  %s1116_s26 = sphi %s1185_s26, %s1583_s26   ;;  %s1112_s25 = sphi %s1183_s25, %s1582_s25   ;;  %s1108_s24 = sphi %s1181_s24, %s1581_s24   ;;  %s1104_s23 = sphi %s1179_s23, %s1580_s23   ;;  %s1100_s22 = sphi %s1177_s22, %s1579_s22   ;;  %s1096_s21 = sphi %s1175_s21, %s1578_s21   ;;  %s1092_s20 = sphi %s1173_s20, %s1572_s20   ;;  %s1088_s19 = sphi %s1171_s19, %s1571_s19   ;;  %s1084_s18 = sphi %s1169_s18, %s1570_s18   ;;  %s1080_s17 = sphi %s1167_s17, %s1577_s17   ;;  %s1076_s16 = sphi %s1165_s16, %s1576_s16   ;;  %s1072_s15 = sphi %s1163_s15, %s1575_s15  }
  0x11   : > { %1533 = sst [smem:[#allocation14_spill]] %s1092_s20  ;;  %s32_s30 = sadd.s32 1, %s1116_s26 }
  0x12   : > { %1534 = sst [smem:[#allocation15_spill]] %s1096_s21  ;;  %p1235_p0 = scmp.ge.s32.totalorder %s32_s30, 2 }
  0x13   : > { %1535 = sst [smem:[#allocation16_spill]] %s1108_s24  ;;  %p1527_p1 = scmp.eq.s32.totalorder %s1124_s28, 0 }
  0x14   : > { %1536 = sst [smem:[#allocation17_spill]] %s1112_s25  ;;  %p1517_p2 = scmp.eq.s32.totalorder %s1232_s29, 0 }
  0x15   : > { %s91_s6 = sadd.s32 1, %s1092_s20  ;;  %s1586_s30 = smov (%p1235_p0, %s32_s30), 0 }
  0x16   : > { %1538 = sst [smem:[#allocation18_spill]] %s1586_s30  ;;  %p98_p3 = scmp.ne.s32.totalorder %s1092_s20, %s1088_s19 }
  0x17   : > { %p104_p4 = scmp.ne.s32.totalorder %s1088_s19, %s1084_s18  ;;  %s1251_s7 = ssub.s32 %s1116_s26, %s1586_s30 }
  0x18   : > { %p89_p5 = scmp.eq.s32.totalorder %s1251_s7, 0  ;;  %p100_p6 = por %p98_p3, %p1527_p1 }
  0x19   : > { %p1258_p7 = por %p104_p4, %p1517_p2  ;;  %p758_p8 = scmp.lt.s32.totalorder %s1124_s28, 4 }
  0x1a   : > { %s1264_s9 = scalar_select %p89_p5, %s1092_s20, %s91_s6  }
  0x1b   : > { %s1539_s8 = scalar_select %p1258_p7, 1, 0 }
  0x1c   : > { %1541 = sst [smem:[#allocation20_spill]] %s1264_s9  ;;  %s207_s10 = sand.u32 1, %s1124_s28  }
  0x1d   : > { %1540 = sst [smem:[#allocation19_spill]] %s1539_s8  ;;  %s209_s11 = sand.u32 1, %s1092_s20  }
  0x1e   : > { %s662_s12 = sshll.u32 %s209_s11, 5  ;;  %s663_s13 = sshll.u32 %s1116_s26, 6 }
  0x1f   : > { %s1542_s2 = sld [smem:[#allocation24_spill]]  ;;  %s211_s4 = scalar_lea.vmem [#allocation5], %s662_s12 }
  0x20   : > { %s217_s24 = sshll.u32 %s211_s4, 4  ;;  %p1274_p9 = pnand %p758_p8, %p100_p6  ;;  %s218_s24 = int_to_ptr.vmem [resolvable:$true] %s217_s24 }
  0x21   : > { %s1278_s1 = scalar_lea.sflag [#allocation6], %s207_s10  ;;  %s901_s6 = scalar_lea.vmem %s218_s24, 512 }
  0x22   : > { %p890_p10 = pneg %p1274_p9  ;;  %p902_p11 = scmp.ne.s32.totalorder %s218_s24, %s901_s6 }
  0x23   : > { %s1126_s11 = smov [#allocation5]  }
  0x24   : > { %p904_p12 = pnand %p902_p11, %p890_p10  ;;  %s906_s14 = sshll.u32 %s1126_s11, 4  ;;  %s907_s14 = int_to_ptr.vmem [resolvable:$false] %s906_s14 }
  0x25   : > { %s216_s30 = scalar_lea.hbm %s1542_s2, %s663_s13  ;;  %s908_s12 = scalar_lea.vmem %s907_s14, 1024 }
  0x26   : > { %p905_p13 = pneg %p904_p12  ;;  %p909_p3 = scmp.lt.s32.totalorder %s218_s24, %s907_s14 }
  0x27   : > { %p910_p4 = scmp.lt.s32.totalorder %s908_s12, %s901_s6 }
  0x29   : > { %p911_p5 = por %p910_p4, %p909_p3 }
  0x2b   : > { %p912_p6 = pnand %p911_p5, %p905_p13 }
  0x2d   : > { %915 = shalt.err (!%p912_p6)
}
  0x2e   : > { %s1518_s4 = smov 128   ;;  %s1515_s10 = smov 64  }
  0x2f   : > { %s1516_s13 = smov 4   ;;  %p667_p10 = scmp.ge.s32.totalorder %s1124_s28, 1 }
  0x30   : > { %750 = dma.hbm_to_vmem [thread:$0]  (!%p1274_p9), %s216_s30, 512, %s218_s24, %s1278_s1, %s1518_s4, %s1515_s10, %s1516_s13  }
  0x31   : > { %p246_p11 = scmp.lt.s32.totalorder %s1124_s28, 5  ;;  %s656_s6 = sadd.s32 4294967294, %s1124_s28  }
  0x32   : > { %s35_s11 = sadd.s32 1, %s1120_s27  ;;  %s44_s14 = sadd.s32 1, %s1104_s23 }
  0x33   : > { %p1290_p12 = pnand %p667_p10, %p246_p11  ;;  %s1588_s11 = smov (!%p1235_p0, %s35_s11), %s1120_s27 }
  0x34   : > { %p51_p13 = scmp.ne.s32.totalorder %s1104_s23, %s1100_s22  ;;  %p57_p3 = scmp.ne.s32.totalorder %s1100_s22, %s1096_s21 }
  0x35   : > { %p37_p9 = scmp.ge.s32.totalorder %s1588_s11, 2  ;;  %p156_p4 = scmp.eq.s32.totalorder %s1232_s29, 3 }
  0x36   : > { %p1307_p5 = por %p1527_p1, %p51_p13  ;;  %p1313_p6 = por %p1517_p2, %p57_p3 }
  0x37   : > { %s1590_s11 = smov (%p37_p9, %s1588_s11), 0  ;;  %p1319_p0 = por %p156_p4, %p51_p13 }
  0x38   : > { %1547 = sst [smem:[#allocation21_spill]] %s1590_s11  ;;  %p162_p10 = scmp.eq.s32.totalorder %s656_s6, 3 }
  0x39   : > { %s1548_s30 = scalar_select %p1319_p0, 1, 0 }
  0x3a   : > { %s1325_s5 = ssub.s32 %s1120_s27, %s1590_s11  ;;  %s185_s12 = sand.u32 1, %s1104_s23  }
  0x3b   : > { %1549 = sst [smem:[#allocation22_spill]] %s1548_s30  ;;  %s41_s10 = sor.u32 %s1251_s7, %s1325_s5 }
  0x3c   : > { %p1330_p11 = por %p162_p10, %p57_p3  ;;  %p42_p2 = scmp.eq.s32.totalorder %s41_s10, 0 }
  0x3d   : > { %s659_s4 = sshll.u32 %s185_s12, 4  ;;  %s660_s2 = sshll.u32 %s1120_s27, 2 }
  0x3e   : > { %s1550_s13 = scalar_select %p1330_p11, 1, 0 }
  0x3f   : > { %s1336_s9 = scalar_select %p42_p2, %s1104_s23, %s44_s14  }
  0x40   : > { %s194_s20 = sadd.s32 %s1116_s26, %s660_s2  ;;  %s189_s30 = scalar_lea.vmem [#allocation2], %s659_s4 }
  0x41   : > { %s661_s21 = sshll.u32 %s194_s20, 7  ;;  %s197_s8 = sshll.u32 %s189_s30, 4  ;;  %s198_s8 = int_to_ptr.vmem [resolvable:$true] %s197_s8 }
  0x42   : > { %s196_s11 = scalar_lea.hbm %s1507_s0, %s661_s21  ;;  %p1346_p13 = pnand %p758_p8, %p1307_p5 }
  0x43   : > { %s186_s10 = scalar_lea.sflag [#allocation3], %s185_s12  ;;  %s929_s14 = scalar_lea.vmem %s198_s8, 256 }
  0x44   : > { %p918_p2 = pneg %p1346_p13  ;;  %p930_p3 = scmp.ne.s32.totalorder %s198_s8, %s929_s14 }
  0x45   : > { %s1130_s2 = smov [#allocation2]  }
  0x46   : > { %p932_p9 = pnand %p930_p3, %p918_p2  ;;  %s934_s20 = sshll.u32 %s1130_s2, 4  ;;  %s935_s20 = int_to_ptr.vmem [resolvable:$false] %s934_s20 }
  0x47   : > { %s936_s19 = scalar_lea.vmem %s935_s20, 512  ;;  %p937_p10 = scmp.lt.s32.totalorder %s198_s8, %s935_s20 }
  0x48   : > { %p933_p4 = pneg %p932_p9  ;;  %p938_p1 = scmp.lt.s32.totalorder %s936_s19, %s929_s14 }
  0x4a   : > { %p939_p11 = por %p938_p1, %p937_p10 }
  0x4c   : > { %p940_p0 = pnand %p939_p11, %p933_p4 }
  0x4e   : > { %943 = shalt.err (!%p940_p0)
}
  0x4f   : > { %s1131_s21 = smov 256   ;;  %s1132_s4 = smov 8  }
  0x50   : > { %s1552_s24 = smov 128   ;;  %p115_p1 = scmp.eq.s32.totalorder %s1325_s5, 0 }
  0x51   : > { %747 = dma.hbm_to_vmem [thread:$0]  (!%p1346_p13), %s196_s11, 256, %s198_s8, %s186_s10, %s1131_s21, %s1552_s24, %s1132_s4  }
  0x52   : > { %s117_s30 = sadd.s32 1, %s1080_s17  ;;  %p124_p5 = scmp.ne.s32.totalorder %s1080_s17, %s1076_s16 }
  0x53   : > { %p130_p0 = scmp.ne.s32.totalorder %s1076_s16, %s1072_s15  ;;  %p1553_p11 = scmp.eq.s32.totalorder %s1124_s28, 0 }
  0x54   : > { %s1362_s12 = scalar_select %p115_p1, %s1080_s17, %s117_s30  }
  0x55   : > { %p126_p2 = por %p124_p5, %p1553_p11  ;;  %p1554_p3 = scmp.eq.s32.totalorder %s1232_s29, 0 }
  0x56   : > { %s229_s14 = sand.u32 1, %s1080_s17   ;;  %s693_s2 = sshll.u32 %s1120_s27, 8 }
  0x57   : > { %p1368_p9 = por %p130_p0, %p1554_p3  ;;  %s664_s20 = sshll.u32 %s229_s14, 4 }
  0x58   : > { %s237_s8 = scalar_lea.hbm %s1510_s3, %s693_s2  ;;  %p1379_p13 = pnand %p758_p8, %p126_p2 }
  0x59   : > { %s231_s15 = scalar_lea.vmem [#allocation7], %s664_s20  ;;  %s1133_s21 = smov [#allocation7]  }
  0x5a   : > { %s238_s5 = sshll.u32 %s231_s15, 4  ;;  %p946_p4 = pneg %p1379_p13  ;;  %s239_s5 = int_to_ptr.vmem [resolvable:$true] %s238_s5 }
  0x5b   : > { %s957_s10 = scalar_lea.vmem %s239_s5, 256  ;;  %s962_s4 = sshll.u32 %s1133_s21, 4  ;;  %s963_s4 = int_to_ptr.vmem [resolvable:$false] %s962_s4 }
  0x5c   : > { %p958_p10 = scmp.ne.s32.totalorder %s239_s5, %s957_s10  ;;  %s964_s24 = scalar_lea.vmem %s963_s4, 512 }
  0x5d   : > { %p965_p0 = scmp.lt.s32.totalorder %s239_s5, %s963_s4  ;;  %p966_p11 = scmp.lt.s32.totalorder %s964_s24, %s957_s10 }
  0x5e   : > { %p960_p1 = pnand %p958_p10, %p946_p4 }
  0x5f   : > { %p967_p8 = por %p966_p11, %p965_p0 }
  0x60   : > { %p961_p5 = pneg %p960_p1 }
  0x62   : > { %p968_p2 = pnand %p967_p8, %p961_p5 }
  0x64   : > { %971 = shalt.err (!%p968_p2)
}
  0x65   : > { %s1557_s30 = smov 4   ;;  %s1558_s14 = smov 64  }
  0x66   : > { %753 = dma.hbm_to_vmem [thread:$0]  (!%p1379_p13), %s237_s8, 256, %s239_s5, %s1278_s1, %s1558_s14, %s1558_s14, %s1557_s30  }
  0x67   : > { %250 = sbr.rel (%p1290_p12) target bundleno = 360 (0x168), region = 36  ;;  %s1394_s2 = sand.u32 (!%p1290_p12), 1, %s1100_s22  }
  0x68   : > { %s668_s20 = sshll.u32 (!%p1290_p12), %s1394_s2, 4  ;;  %s253_s19 = scalar_lea.sflag (!%p1290_p12), [#allocation3], %s1394_s2 }
  0x69   : > { %s256_s7 = scalar_lea.vmem (!%p1290_p12), [#allocation2], %s668_s20 }
  0x6c   : > { %1055 = dma.done.wait (%p1313_p6), %s253_s19, 256  }
  0x6d   : > { %1057 = vsyncadd (%p1313_p6), %s253_s19, 4294967040  ;;  %s1559_s1 = sld [smem:[#allocation13_spill]]  ;;  %s261_s8 = sand.u32 1, %s1232_s29  }
  0x6e   : > { %s262_s5 = scalar_lea.sflag [#allocation6], %s261_s8 }
  0x73   : > { %s263_s11 = sand.u32 1, %s1559_s1  }
  0x74   : > { %s669_s15 = sshll.u32 %s263_s11, 5 }
  0x75   : > { %s265_s10 = scalar_lea.vmem [#allocation5], %s669_s15 }
  0x76   : > { %1059 = dma.done.wait (%p1258_p7), %s262_s5, 512  }
  0x77   : > { %1061 = vsyncadd (%p1258_p7), %s262_s5, 4294966784  ;;  %s272_s21 = sand.u32 1, %s1076_s16  }
  0x78   : > { %s670_s4 = sshll.u32 %s272_s21, 4 }
  0x79   : > { %s274_s24 = scalar_lea.vmem [#allocation7], %s670_s4 }
  0x7a   : > { %1063 = dma.done.wait (%p1368_p9), %s262_s5, 256  }
  0x7b   : > { %1065 = vsyncadd (%p1368_p9), %s262_s5, 4294967040  ;;  %v880_v0 = vld [vmem:[%s265_s10 + $0x18] sm:$0xff]   ;;  %v881_v1 = vld [vmem:[%s265_s10 + $0x10] sm:$0xff]   ;;  %vm429_vm0 = vcmask 130048   ;;  %s1561_s30 = sld [smem:[#allocation23_spill]]  ;;  %vm363_vm1 = vcmask 523264  }
  0x7c   : > { %718 = vmatprep.subr.bf16.mxu0 %v880_v0  ;;  %v310_v2 = vld [vmem:[%s256_s7] sm:$0xff]  ;;  %v311_v3 = vld [vmem:[%s256_s7 + $0x8] sm:$0xff]  ;;  %s1562_s6 = sld [smem:[#allocation17_spill]]  ;;  %s308_s8 = scalar_lea.vmem [#allocation8], %s668_s20 }
  0x7d   : > { %719 = vmatpush3.bf16.msra.mxu0 %v880_v0  ;;  %v312_v4 = vpack.c.bf16 %v311_v3, %v310_v2  ;;  %v882_v5 = vld [vmem:[%s265_s10 + $0x8] sm:$0xff]   ;;  %v886_v8 = vld [vmem:[%s274_s24] sm:$0xff]   ;;  %s1563_s7 = sld [smem:[#allocation16_spill]]  ;;  %s524_s11 = sshll.u32 %s308_s8, 4  ;;  %s1425_s11 = int_to_ptr.vmem [resolvable:$true] %s524_s11 }
  0x7e   : > { %720 = vmatprep.subr.bf16.mxu0 %v881_v1  ;;  %v885_v9 = vld [vmem:[%s265_s10] sm:$0xff]   ;;  %726 = vmatprep.mubr.msk.bf16.mxu0 %vm363_vm1, %v886_v8  ;;  %v887_v10 = vld [vmem:[%s274_s24 + $0x8] sm:$0xff]   ;;  %s1564_s15 = sld [smem:[#allocation22_spill]]  ;;  %s510_s20 = scalar_lea.sflag [#allocation4], %s1394_s2 }
  0x7f   : > { %730 = vmatprep.subr.bf16.mxu1 %v312_v4  ;;  %s1565_s4 = sld [smem:[#allocation25_spill]]  ;;  %s972_s29 = scalar_lea.vmem %s1425_s11, 256 }
  0x80   : > { %731 = vmatpush3.bf16.msra.mxu1 %v312_v4  ;;  %p973_p7 = scmp.ne.s32.totalorder %s1425_s11, %s972_s29  ;;  %s1134_s25 = smov [#allocation8]  }
  0x81   : > { %v883_v6 = vld [vmem:[%s1561_s30] sm:$0xff]   ;;  %v884_v7 = vld [vmem:[%s1561_s30 + $0x8] sm:$0xff]   ;;  %721 = vmatpush3.bf16.msra.mxu0 %v881_v1  ;;  %s976_s14 = sshll.u32 %s1134_s25, 4  ;;  %s977_s14 = int_to_ptr.vmem [resolvable:$false] %s976_s14 }
  0x82   : > { %732 = vmatprep.mubr.msk.bf16.mxu1 %vm429_vm0, %v883_v6  ;;  %722 = vmatprep.subr.bf16.mxu0 %v882_v5  ;;  %s689_s1 = sshll.u32 %s1562_s6, 3  ;;  %s978_s19 = scalar_lea.vmem %s977_s14, 512 }
  0x83   : > { %733 = vmatmul.mubr.msk.bf16.vlgmr.msra.gmra.mxu1 %vm429_vm0, %v884_v7  ;;  %s521_s18 = sadd.s32 %s1563_s7, %s689_s1  ;;  %p979_p9 = scmp.lt.s32.totalorder %s1425_s11, %s977_s14 }
  0x84   : > { %s690_s5 = sshll.u32 %s521_s18, 6  ;;  %p1566_p12 = scmp.ne.s32.totalorder %s1564_s15, 0 }
  0x85   : > { %723 = vmatpush3.bf16.msra.mxu0 %v882_v5  ;;  %s1430_s24 = scalar_lea.hbm %s1565_s4, %s690_s5  ;;  %p980_p13 = scmp.lt.s32.totalorder %s978_s19, %s972_s29 }
  0x86   : > { %724 = vmatprep.subr.bf16.mxu0 %v885_v9  ;;  %p974_p6 = pnand %p973_p7, %p1566_p12 }
  0x87   : > { %p981_p4 = por %p980_p13, %p979_p9 }
  0x88   : > { %p975_p3 = pneg %p974_p6 }
  0x89   : > { %725 = vmatpush3.bf16.msra.mxu0 %v885_v9 }
  0x8a   : > { %p982_p10 = pnand %p981_p4, %p975_p3 }
  0x8c   : > { %727 = vmatmul.mubr.msk.bf16.vlgmr.msra.gmra.mxu0 %vm363_vm1, %v887_v10 }
 0x143   : > { %v734_v11 = vpop.f32.mrf.mxu1 }
 0x145   : > { %v470_v12 = vpop.f32.mrf.mxu1 }
 0x147   : > { %v735_v14 = vpop.f32.mrf.mxu1 }
 0x149   : > { %v473_v20 = vpop.f32.mrf.mxu1 }
 0x14c   : > { %v728_v13 = vpop.f32.mrf.mxu0 }
 0x14d   : > { %v479_v16 = vadd.f32 %v734_v11, %v728_v13 }
 0x14e   : > { %v404_v15 = vpop.f32.mrf.mxu0 }
 0x14f   : > { %v471_v18 = vadd.f32 %v470_v12, %v404_v15  ;;  %v487_v22 = vmax.f32 %v479_v16, 0.0 }
 0x150   : > { %v729_v17 = vpop.f32.mrf.mxu0 }
 0x151   : > { %v482_v19 = vadd.f32 %v735_v14, %v729_v17  ;;  %v485_v25 = vmax.f32 %v471_v18, 0.0 }
 0x152   : > { %v407_v21 = vpop.f32.mrf.mxu0 }
 0x153   : > { %v488_v23 = vmax.f32 %v482_v19, 0.0  ;;  %v474_v24 = vadd.f32 %v473_v20, %v407_v21 }
 0x155   : > { %v706_v26 = vpack.c.bf16 %v488_v23, %v487_v22  ;;  %v486_v27 = vmax.f32 %v474_v24, 0.0 }
 0x157   : > { %708 = vst [vmem:[%s308_s8 + $0x8] sm:$0xff] %v706_v26   ;;  %v701_v28 = vpack.c.bf16 %v486_v27, %v485_v25 }
 0x159   : > { %702 = vst [vmem:[%s308_s8] sm:$0xff] %v701_v28  }
 0x15a   : > { %985 = shalt.err (!%p982_p10)
}
 0x15b   : > { %s986_s6 = scalar_lea.hbm %s1430_s24, 256  ;;  %s990_s18 = scalar_lea.hbm %s1565_s4, 1024 }
 0x15c   : > { %p987_p1 = scmp.ne.s32.totalorder %s1430_s24, %s986_s6  ;;  %p991_p11 = scmp.lt.s32.totalorder %s1430_s24, %s1565_s4 }
 0x15d   : > { %p992_p8 = scmp.lt.s32.totalorder %s990_s18, %s986_s6 }
 0x15e   : > { %p988_p5 = pnand %p987_p1, %p1566_p12 }
 0x15f   : > { %p993_p2 = por %p992_p8, %p991_p11 }
 0x160   : > { %p989_p0 = pneg %p988_p5 }
 0x162   : > { %p994_p7 = pnand %p993_p2, %p989_p0 }
 0x164   : > { %997 = shalt.err (!%p994_p7)
}
 0x165   : > { %s1135_s10 = smov 64   ;;  %s1136_s21 = smov 128  }
 0x166   : > { %s1137_s29 = smov 4  }
 0x167   : > { %742 = dma.vmem_to_hbm [thread:$0]  (%p1566_p12), %s1425_s11, 256, %s1430_s24, %s510_s20, %s1135_s10, %s1136_s21, %s1137_s29  }
 0x168 PF: > { %s1567_s25 = sld [smem:[#allocation15_spill]]  ;;  %p759_p6 = scmp.ge.s32.totalorder %s1124_s28, 2 }
 0x169   : > { %p1568_p3 = scmp.ne.s32.totalorder %s1550_s13, 0 }
 0x16b   : > { %p755_p9 = pnand %p759_p6, %p1568_p3 }
 0x16d   : > { %p756_p13 = pneg %p755_p9 }
 0x16e   : > { %s539_s14 = sand.u32 1, %s1567_s25  }
 0x16f   : > { %s540_s19 = scalar_lea.sflag [#allocation4], %s539_s14 }
 0x170   : > { %1067 = dma.done.wait (%p756_p13), %s540_s19, 256  }
 0x171   : > { %1069 = vsyncadd (%p756_p13), %s540_s19, 4294967040  ;;  %s23_s28 = sadd.s32 1, %s1124_s28   ;;  %s1570_s18 = sld [smem:[#allocation13_spill]] }
 0x172   : > { %p1460_p4 = scmp.ge.s32.totalorder %s23_s28, 6   ;;  %s1571_s19 = sld [smem:[#allocation14_spill]] }
 0x173   : > { %s1572_s20 = sld [smem:[#allocation20_spill]]  ;;  %s1575_s15 = smov %s1076_s16 }
 0x174   : > { %s1573_s13 = sld [smem:[#allocation18_spill]]  ;;  %s1576_s16 = smov %s1080_s17 }
 0x175   : > { %s1574_s2 = sld [smem:[#allocation21_spill]]  ;;  %s1577_s17 = smov %s1362_s12 }
 0x176   : > { %s1578_s21 = smov %s1100_s22  ;;  %s1579_s22 = smov %s1104_s23 }
 0x177   : > { %s1580_s23 = smov %s1336_s9  ;;  %s1581_s24 = smov %s1116_s26 }
 0x178   : > { %s1582_s25 = smov %s1120_s27  ;;  %22 = sbr.rel (!%p1460_p4) target bundleno = 16 (0x10), region = 105 }
 0x17a   : > { %s1583_s26 = smov %s1573_s13 }
 0x17b   : > { %s1584_s27 = smov %s1574_s2 }
 0x17d   :  { %545 = vsyncpa [#allocation3], 1 }
 0x17e   :  { %547 = vsyncpa [#allocation3 + $0x1], 1 }
 0x17f   :  { %548 = vsyncpa [#allocation6], 1 }
 0x180   :  { %550 = vsyncpa [#allocation6 + $0x1], 1 }
 0x181   :  { %551 = vsyncpa [#allocation4], 1 }
 0x182   :  { %553 = vsyncpa [#allocation4 + $0x1], 1 }

</bundles_post_ra>
